<compile_context>
chip_gen: v5e
topology: v5e:2x2
jax: 0.10.0
libtpu: 0.0.40
codegen_flags: <defaults>
</compile_context>

<pallas_src>
import functools

import jax
import jax.numpy as jnp
from jax import lax
from jax.experimental import pallas as pl
from jax.experimental.pallas import tpu as pltpu

EPS = 1e-10
_LANES = 128
_TARGET_TILE_BYTES = 2 * 1024 * 1024   # per-operand lane tile, in input dtype


# ----------------------------------------------------------------------------
# host-side tiling helpers
# ----------------------------------------------------------------------------
def _cdiv(a, b):
    return -(-a // b)


def _choose_tiles(rows, n, itemsize):
    # Row (sublane) tile: small so each accumulator carry is ~1 vreg and so the
    # "parallel" row axis gets >= 2 steps whenever rows allows it (v7x 2 TCs).
    min_sublane = 16 if itemsize == 2 else 8
    row_tile = rows if rows <= min_sublane else min_sublane

    # Lane tile: ~2 MiB of *input dtype* per operand tile.  No divisibility
    # requirement: the grid uses cdiv and the ragged tail is masked in-kernel.
    budget_groups = max(1, _TARGET_TILE_BYTES // (row_tile * _LANES * itemsize))
    groups_needed = _cdiv(n, _LANES)
    n_tile = min(budget_groups, groups_needed) * _LANES
    return row_tile, n_tile


# ----------------------------------------------------------------------------
# in-kernel lane fold (VPU-only; the XLU reduce happens once in finalize)
# ----------------------------------------------------------------------------
def _lane_fold(o_ref, t_ref, init, step_fn, *, n_groups, n_cols, n_tile,
               needs_mask):
    """Fold the tile's 128-lane chunks into (row_tile, 128) partials."""
    row_tile = o_ref.shape[0]

    if needs_mask:
        # Hoisted once per grid step (JAX does not CSE broadcast_in_dim).
        lane_iota = lax.broadcasted_iota(jnp.int32, (row_tile, _LANES), 1)
        remaining = n_cols - pl.program_id(1) * n_tile   # scalar, traced

    def fold_one(j, carry):
        if isinstance(j, int):
            start = j * _LANES
        else:
            start = pl.multiple_of(j * _LANES, _LANES)
        oc = o_ref[:, pl.ds(start, _LANES)].astype(jnp.float32)
        tc = t_ref[:, pl.ds(start, _LANES)].astype(jnp.float32)
        valid = (lane_iota + j * _LANES) < remaining if needs_mask else None
        return step_fn(carry, oc, tc, valid)

    if n_groups <= 16:
        carry = init
        for j in range(n_groups):
            carry = fold_one(j, carry)
        return carry
    return lax.fori_loop(0, n_groups, fold_one, init, unroll=8)


# ----------------------------------------------------------------------------
# kernels
# ----------------------------------------------------------------------------
def _dice_step(carry, oc, tc, valid):
    if valid is not None:
        oc = jnp.where(valid, oc, 0.0)
        tc = jnp.where(valid, tc, 0.0)
    inter, sot = carry
    return inter + oc * tc, sot + (oc + tc)


def _dsc_kernel(o_ref, t_ref, loss_ref, inter_acc, sot_acc, *, n_groups,
                n_cols, n_tile, needs_mask):
    # o_ref/t_ref: (row_tile, n_tile); loss_ref: (row_tile, 1)
    # accumulators: (row_tile, 128) f32, resident across the reduction axis.
    k = pl.program_id(1)

    @pl.when(k == 0)
    def _():
        inter_acc[...] = jnp.zeros_like(inter_acc)
        sot_acc[...] = jnp.zeros_like(sot_acc)

    inter, sot = _lane_fold(
        o_ref, t_ref, (inter_acc[...], sot_acc[...]), _dice_step,
        n_groups=n_groups, n_cols=n_cols, n_tile=n_tile, needs_mask=needs_mask)
    inter_acc[...] = inter
    sot_acc[...] = sot

    @pl.when(k == pl.num_programs(1) - 1)
    def _():
        inter_s = jnp.sum(inter_acc[...], axis=1, keepdims=True)
        union = jnp.sum(sot_acc[...], axis=1, keepdims=True) + EPS
        loss_ref[...] = 1.0 - (2.0 * inter_s + EPS) / union


def _ce_step_soft(carry, oc, tc, valid):
    # Exact soft-target CE term, identical to the PyTorch module.
    term = -tc * jnp.log(oc + EPS) - (1.0 - tc) * jnp.log(1.0 - oc + EPS)
    if valid is not None:
        term = jnp.where(valid, term, 0.0)
    return carry + term


def _ce_step_binary(carry, oc, tc, valid):
    # Exact for t in {0, 1}: a single log per element (EUP relief, esp. v5e).
    term = -jnp.log(jnp.where(tc > 0.5, oc, 1.0 - oc) + EPS)
    if valid is not None:
        term = jnp.where(valid, term, 0.0)
    return carry + term


def _ce_kernel(o_ref, t_ref, sum_ref, acc, *, n_groups, n_cols, n_tile,
               needs_mask, binary_target):
    # Emits per-(b, c) sums of the CE term; the mean over (B, H*W) is outside.
    k = pl.program_id(1)

    @pl.when(k == 0)
    def _():
        acc[...] = jnp.zeros_like(acc)

    step = _ce_step_binary if binary_target else _ce_step_soft
    acc[...] = _lane_fold(o_ref, t_ref, acc[...], step, n_groups=n_groups,
                          n_cols=n_cols, n_tile=n_tile, needs_mask=needs_mask)

    @pl.when(k == pl.num_programs(1) - 1)
    def _():
        sum_ref[...] = jnp.sum(acc[...], axis=1, keepdims=True)


# ----------------------------------------------------------------------------
# wrapper
# ----------------------------------------------------------------------------
def _row_reduce_call(kernel_fn, o2, t2, *, rows, n, row_tile, n_tile, num_acc,
                     flops, transcendentals, extra_kwargs=None):
    grid = (_cdiv(rows, row_tile), _cdiv(n, n_tile))
    n_groups = n_tile // _LANES
    needs_mask = (n % n_tile) != 0
    kw = dict(n_groups=n_groups, n_cols=n, n_tile=n_tile, needs_mask=needs_mask)
    if extra_kwargs:
        kw.update(extra_kwargs)

    in_spec = pl.BlockSpec((row_tile, n_tile), lambda r, k: (r, k))
    out_spec = pl.BlockSpec((row_tile, 1), lambda r, k: (r, 0))
    bytes_accessed = int(o2.size * o2.dtype.itemsize
                         + t2.size * t2.dtype.itemsize + rows * 4)
    return pl.pallas_call(
        functools.partial(kernel_fn, **kw),
        out_shape=jax.ShapeDtypeStruct((rows, 1), jnp.float32),
        grid=grid,
        in_specs=[in_spec, in_spec],
        out_specs=out_spec,
        scratch_shapes=[pltpu.VMEM((row_tile, _LANES), jnp.float32)] * num_acc,
        compiler_params=pltpu.CompilerParams(
            dimension_semantics=("parallel", "arbitrary")),
        cost_estimate=pl.CostEstimate(
            flops=int(flops), transcendentals=int(transcendentals),
            bytes_accessed=bytes_accessed),
    )(o2, t2)


def loss_forward(output, target, mode="Dice", binary_target=False):
    """Equivalent of Loss(mode).forward(output, target). Returns (B, C) f32.

    `output` / `target` may be float32 or bfloat16; accumulation is float32.
    Set `binary_target=True` only when targets are 0/1 masks (CE fast path).
    """
    B, C, H, W = target.shape
    rows, n = B * C, H * W
    o2 = output.reshape(rows, n)
    t2 = target.reshape(rows, n)
    itemsize = max(jnp.dtype(o2.dtype).itemsize, jnp.dtype(t2.dtype).itemsize)
    row_tile, n_tile = _choose_tiles(rows, n, itemsize)

    if mode == "CE":
        per_row = _row_reduce_call(
            _ce_kernel, o2, t2, rows=rows, n=n, row_tile=row_tile,
            n_tile=n_tile, num_acc=1,
            flops=7 * rows * n,
            transcendentals=(1 if binary_target else 2) * rows * n,
            extra_kwargs=dict(binary_target=bool(binary_target)))
        per_bc = per_row.reshape(B, C)
        per_class = jnp.sum(per_bc, axis=0) / jnp.float32(B * n)  # mean(B,H,W)
        return jnp.broadcast_to(per_class[None, :], (B, C))

    if mode != "Dice":
        print("The chosen loss function is not provided!!!! "
              "We use Dice Loss instead!!!")

    per_row = _row_reduce_call(
        _dsc_kernel, o2, t2, rows=rows, n=n, row_tile=row_tile,
        n_tile=n_tile, num_acc=2, flops=5 * rows * n, transcendentals=0)
    return per_row.reshape(B, C)


# ----------------------------------------------------------------------------
# reference + self-test
# ----------------------------------------------------------------------------
def _reference(output, target, mode):
    B, C, H, W = target.shape
    o = output.reshape(B, C, H * W).astype(jnp.float32)
    t = target.reshape(B, C, H * W).astype(jnp.float32)
    if mode == "CE":
        l = -t * jnp.log(o + EPS) - (1.0 - t) * jnp.log(1.0 - o + EPS)
        per_class = jnp.mean(l, axis=(0, 2))                 # (C,)
        return jnp.broadcast_to(per_class[None, :], (B, C))
    inter = jnp.sum(o * t, axis=2)
    union = jnp.sum(o, axis=2) + jnp.sum(t, axis=2) + EPS
    return 1.0 - (2.0 * inter + EPS) / union                 # (B, C)


def _make_inputs(key, B, C, H, W, dtype=jnp.float32):
    k1, k2 = jax.random.split(key)
    output = jax.random.uniform(k1, (B, C, H, W), dtype=jnp.float32,
                                minval=0.01, maxval=0.99).astype(dtype)
    target = (jax.random.uniform(k2, (B, C, H, W), dtype=jnp.float32)
              > 0.5).astype(dtype)
    return output, target


if __name__ == "__main__":
    key = jax.random.PRNGKey(0)

    # ---- aligned case: B=2, C=4, H=W=16 (f32) -------------------------------
    B, C, H, W = 2, 4, 16, 16
    output, target = _make_inputs(key, B, C, H, W)

    dice = jax.block_until_ready(loss_forward(output, target, mode="Dice"))
    ce = jax.block_until_ready(loss_forward(output, target, mode="CE"))
    ce_fast = jax.block_until_ready(
        loss_forward(output, target, mode="CE", binary_target=True))

    assert dice.shape == (B, C) and ce.shape == (B, C)
    assert jnp.allclose(dice, _reference(output, target, "Dice"),
                        rtol=1e-5, atol=1e-6)
    assert jnp.allclose(ce, _reference(output, target, "CE"),
                        rtol=1e-5, atol=1e-6)
    assert jnp.allclose(ce_fast, _reference(output, target, "CE"),
                        rtol=1e-5, atol=1e-6)

    # ---- bf16 ingestion path (half the HBM traffic; f32 accumulation) ------
    o_bf = output.astype(jnp.bfloat16)
    t_bf = target.astype(jnp.bfloat16)
    dice_bf = jax.block_until_ready(loss_forward(o_bf, t_bf, mode="Dice"))
    ref_bf = _reference(o_bf.astype(jnp.float32), t_bf.astype(jnp.float32),
                        "Dice")
    assert jnp.allclose(dice_bf, ref_bf, rtol=1e-5, atol=1e-5)

    # ---- unaligned case: ragged row tiles + masked ragged lane tail --------
    B2, C2, H2, W2 = 3, 5, 15, 15           # rows=15 (not %8), n=225 (not %128)
    out2, tgt2 = _make_inputs(jax.random.PRNGKey(1), B2, C2, H2, W2)
    dice2 = jax.block_until_ready(loss_forward(out2, tgt2, mode="Dice"))
    ce2 = jax.block_until_ready(loss_forward(out2, tgt2, mode="CE"))
    assert jnp.allclose(dice2, _reference(out2, tgt2, "Dice"),
                        rtol=1e-5, atol=1e-6)
    assert jnp.allclose(ce2, _reference(out2, tgt2, "CE"),
                        rtol=1e-5, atol=1e-6)

    print("KERNEL_OK")
</pallas_src>

<mosaic_0001>
module attributes {stable_mosaic.version = 11 : i64} {
  func.func @_dsc_kernel(%arg0: i32, %arg1: i32, %arg2: memref<8x256xf32, #tpu.memory_space<vmem>>, %arg3: memref<8x256xf32, #tpu.memory_space<vmem>>, %arg4: memref<8x1xf32, #tpu.memory_space<vmem>>, %arg5: memref<8x128xf32, #tpu.memory_space<vmem>>, %arg6: memref<8x128xf32, #tpu.memory_space<vmem>>) attributes {dimension_semantics = [#tpu.dimension_semantics<parallel>, #tpu.dimension_semantics<arbitrary>], iteration_bounds = array<i64: 1, 1>, scalar_prefetch = 0 : i64, scratch_operands = 2 : i64, tpu.core_type = #tpu.core_type<tc>, window_params = [{transform_indices = @transform_0, window_bounds = array<i64: 8, 256>}, {transform_indices = @transform_1, window_bounds = array<i64: 8, 256>}, {transform_indices = @transform_2, window_bounds = array<i64: 8, 1>}]} {
    %c0_i32 = arith.constant 0 : i32
    %0 = arith.cmpi eq, %arg1, %c0_i32 : i32
    %1 = arith.extui %0 : i1 to i32
    %c0_i32_0 = arith.constant 0 : i32
    %2 = arith.cmpi ne, %1, %c0_i32_0 : i32
    scf.if %2 {
      %cst = arith.constant 0.000000e+00 : f32
      %22 = vector.broadcast %cst : f32 to vector<8x128xf32>
      %c0_17 = arith.constant 0 : index
      %c0_18 = arith.constant 0 : index
      %23 = vector.load %arg5[%c0_17, %c0_18] : memref<8x128xf32, #tpu.memory_space<vmem>>, vector<8x128xf32>
      tpu.vector_store %arg5[%c0_17, %c0_18], %22 {strides = array<i32>} : memref<8x128xf32, #tpu.memory_space<vmem>>, vector<8x128xf32>,
      %cst_19 = arith.constant 0.000000e+00 : f32
      %24 = vector.broadcast %cst_19 : f32 to vector<8x128xf32>
      %c0_20 = arith.constant 0 : index
      %c0_21 = arith.constant 0 : index
      %25 = vector.load %arg6[%c0_20, %c0_21] : memref<8x128xf32, #tpu.memory_space<vmem>>, vector<8x128xf32>
      tpu.vector_store %arg6[%c0_20, %c0_21], %24 {strides = array<i32>} : memref<8x128xf32, #tpu.memory_space<vmem>>, vector<8x128xf32>,
    } else {
    }
    %c0 = arith.constant 0 : index
    %c0_1 = arith.constant 0 : index
    %3 = vector.load %arg5[%c0, %c0_1] : memref<8x128xf32, #tpu.memory_space<vmem>>, vector<8x128xf32>
    %c0_2 = arith.constant 0 : index
    %c0_3 = arith.constant 0 : index
    %4 = vector.load %arg6[%c0_2, %c0_3] : memref<8x128xf32, #tpu.memory_space<vmem>>, vector<8x128xf32>
    %c0_4 = arith.constant 0 : index
    %c0_5 = arith.constant 0 : index
    %5 = vector.load %arg2[%c0_4, %c0_5] : memref<8x256xf32, #tpu.memory_space<vmem>>, vector<8x128xf32>
    %c0_6 = arith.constant 0 : index
    %c0_7 = arith.constant 0 : index
    %6 = vector.load %arg3[%c0_6, %c0_7] : memref<8x256xf32, #tpu.memory_space<vmem>>, vector<8x128xf32>
    %7 = arith.mulf %5, %6 : vector<8x128xf32>
    %8 = arith.addf %3, %7 : vector<8x128xf32>
    %9 = arith.addf %5, %6 : vector<8x128xf32>
    %10 = arith.addf %4, %9 : vector<8x128xf32>
    %c0_8 = arith.constant 0 : index
    %c128 = arith.constant 128 : index
    %11 = vector.load %arg2[%c0_8, %c128] : memref<8x256xf32, #tpu.memory_space<vmem>>, vector<8x128xf32>
    %c0_9 = arith.constant 0 : index
    %c128_10 = arith.constant 128 : index
    %12 = vector.load %arg3[%c0_9, %c128_10] : memref<8x256xf32, #tpu.memory_space<vmem>>, vector<8x128xf32>
    %13 = arith.mulf %11, %12 : vector<8x128xf32>
    %14 = arith.addf %8, %13 : vector<8x128xf32>
    %15 = arith.addf %11, %12 : vector<8x128xf32>
    %16 = arith.addf %10, %15 : vector<8x128xf32>
    %c0_11 = arith.constant 0 : index
    %c0_12 = arith.constant 0 : index
    %17 = vector.load %arg5[%c0_11, %c0_12] : memref<8x128xf32, #tpu.memory_space<vmem>>, vector<8x128xf32>
    tpu.vector_store %arg5[%c0_11, %c0_12], %14 {strides = array<i32>} : memref<8x128xf32, #tpu.memory_space<vmem>>, vector<8x128xf32>,
    %c0_13 = arith.constant 0 : index
    %c0_14 = arith.constant 0 : index
    %18 = vector.load %arg6[%c0_13, %c0_14] : memref<8x128xf32, #tpu.memory_space<vmem>>, vector<8x128xf32>
    tpu.vector_store %arg6[%c0_13, %c0_14], %16 {strides = array<i32>} : memref<8x128xf32, #tpu.memory_space<vmem>>, vector<8x128xf32>,
    %c0_i32_15 = arith.constant 0 : i32
    %19 = arith.cmpi eq, %arg1, %c0_i32_15 : i32
    %20 = arith.extui %19 : i1 to i32
    %c0_i32_16 = arith.constant 0 : i32
    %21 = arith.cmpi ne, %20, %c0_i32_16 : i32
    scf.if %21 {
      %c0_17 = arith.constant 0 : index
      %c0_18 = arith.constant 0 : index
      %22 = vector.load %arg5[%c0_17, %c0_18] : memref<8x128xf32, #tpu.memory_space<vmem>>, vector<8x128xf32>
      %cst = arith.constant dense<0.000000e+00> : vector<8xf32>
      %23 = vector.multi_reduction <add>, %22, %cst [1] : vector<8x128xf32> to vector<8xf32>
      %24 = vector.shape_cast %23 : vector<8xf32> to vector<8x1xf32>
      %c0_19 = arith.constant 0 : index
      %c0_20 = arith.constant 0 : index
      %25 = vector.load %arg6[%c0_19, %c0_20] : memref<8x128xf32, #tpu.memory_space<vmem>>, vector<8x128xf32>
      %cst_21 = arith.constant dense<0.000000e+00> : vector<8xf32>
      %26 = vector.multi_reduction <add>, %25, %cst_21 [1] : vector<8x128xf32> to vector<8xf32>
      %27 = vector.shape_cast %26 : vector<8xf32> to vector<8x1xf32>
      %cst_22 = arith.constant 1.000000e-10 : f32
      %28 = vector.broadcast %cst_22 : f32 to vector<8x1xf32>
      %29 = arith.addf %27, %28 : vector<8x1xf32>
      %cst_23 = arith.constant 2.000000e+00 : f32
      %30 = vector.broadcast %cst_23 : f32 to vector<8x1xf32>
      %31 = arith.mulf %30, %24 : vector<8x1xf32>
      %cst_24 = arith.constant 1.000000e-10 : f32
      %32 = vector.broadcast %cst_24 : f32 to vector<8x1xf32>
      %33 = arith.addf %31, %32 : vector<8x1xf32>
      %34 = arith.divf %33, %29 : vector<8x1xf32>
      %cst_25 = arith.constant 1.000000e+00 : f32
      %35 = vector.broadcast %cst_25 : f32 to vector<8x1xf32>
      %36 = arith.subf %35, %34 : vector<8x1xf32>
      %c0_26 = arith.constant 0 : index
      %c0_27 = arith.constant 0 : index
      %37 = vector.load %arg4[%c0_26, %c0_27] : memref<8x1xf32, #tpu.memory_space<vmem>>, vector<8x1xf32>
      tpu.vector_store %arg4[%c0_26, %c0_27], %36 {strides = array<i32>} : memref<8x1xf32, #tpu.memory_space<vmem>>, vector<8x1xf32>,
    } else {
    }
    return
  }
  func.func @transform_0(%arg0: i32, %arg1: i32) -> (i32, i32) {
    %c0_i32 = arith.constant 0 : i32
    return %arg0, %arg1 : i32, i32
  }
  func.func @transform_1(%arg0: i32, %arg1: i32) -> (i32, i32) {
    %c0_i32 = arith.constant 0 : i32
    return %arg0, %arg1 : i32, i32
  }
  func.func @transform_2(%arg0: i32, %arg1: i32) -> (i32, i32) {
    %c0_i32 = arith.constant 0 : i32
    %c0_i32_0 = arith.constant 0 : i32
    return %arg0, %c0_i32 : i32, i32
  }
}

</mosaic_0001>

<bundles_post_ra>
// kernel: tpu_custom_call.1
= control target key start
LH: loop header
LB: loop body
LE: loop exit
PB: predicated region body
PF: predicated region fallthrough
CT: control target
= control target key end

     0   :  { %7 = vsyncpa [#allocation5], 0  ;;  %s179_s0 = inlined_call_operand.hbm [shape: f32[8,256], index: 0, kind: input, shape index: {}]   ;;  %s180_s1 = inlined_call_operand.hbm [shape: f32[8,256], index: 1, kind: input, shape index: {}]   ;;  %s181_s2 = inlined_call_operand.vmem [shape: f32[8,1], index: 2, kind: output, shape index: {}]  }
   0x1   :  { %s14_s11 = sshll.u32 %s179_s0, 4  ;;  %s15_s11 = int_to_ptr.hbm [resolvable:$true] %s14_s11 }
   0x2   :  { %8 = vsyncpa [#allocation7], 0  ;;  %s153_s12 = smov [#allocation4]   ;;  %s25_s16 = sshll.u32 %s180_s1, 4  ;;  %s26_s16 = int_to_ptr.hbm [resolvable:$true] %s25_s16 }
   0x3   :  { %s16_s13 = sshll.u32 %s153_s12, 4  ;;  %s154_s17 = smov [#allocation6]   ;;  %s17_s13 = int_to_ptr.vmem [resolvable:$true] %s16_s13 }
   0x4   :  { %19 = dma.hbm_to_vmem [thread:$0]  %s15_s11, 256, %s17_s13, [#allocation5]  }
   0x5   :  { %s27_s18 = sshll.u32 %s154_s17, 4  ;;  %s28_s18 = int_to_ptr.vmem [resolvable:$true] %s27_s18 }
   0x6   :  { %30 = dma.hbm_to_vmem [thread:$0]  %s26_s16, 256, %s28_s18, [#allocation7]  }
   0x7   :  { %149 = dma.done.wait [#allocation5], 256  }
   0x8   :  { %150 = vsyncadd [#allocation5], 4294967040 }
   0x9   :  { %151 = dma.done.wait [#allocation7], 256  }
   0xa   :  { %152 = vsyncadd [#allocation7], 4294967040  ;;  %v47_v0 = vld [vmem:[#allocation4] sm:$0xff]  ;;  %v48_v1 = vld [vmem:[#allocation6] sm:$0xff]  ;;  %vm89_vm4 = vcmask 7168  }
   0xb   :  { %v53_v2 = vld [vmem:[#allocation4 + $0x8] sm:$0xff]  ;;  %v51_v3 = vadd.f32 %v48_v1, %v47_v0  ;;  %v54_v4 = vld [vmem:[#allocation6 + $0x8] sm:$0xff]  ;;  %v49_v7 = vmul.f32 %v48_v1, %v47_v0 }
   0xc   :  { %v57_v5 = vadd.f32 %v54_v4, %v53_v2  ;;  %v55_v8 = vmul.f32 %v54_v4, %v53_v2 }
   0xe   :  { %v58_v6 = vadd.f32 %v57_v5, %v51_v3  ;;  %v56_v9 = vadd.f32 %v55_v8, %v49_v7 }
  0x10   :  { %68 = vadd.xlane.f32.xlu0 %v58_v6 }
  0x18   :  { %65 = vadd.xlane.f32.xlu0 %v56_v9 }
  0x83   :  { %v69_v10 = vpop.xlane.xlu0 %68 }
  0x84   :  { %v70_v11 = vadd.f32 1e-10, %v69_v10 }
  0x86   :  { %99 = vrcp.f32 %v70_v11  ;;  %v84_v17 = vand.u32 2147483648, %v70_v11  ;;  %v82_v19 = vand.u32 2147483647, %v70_v11  ;;  %vm78_vm1 = vweird.f32 %v70_v11 }
  0x88   :  { %v85_v22 = vor.u32 1.1754944e-38, %v84_v17  ;;  %vm83_vm3 = vcmp.eq.f32.partialorder %v82_v19, 8.507059e+37 }
  0x8b   :  { %v66_v13 = vpop.xlane.xlu0 %65 }
  0x8c   :  { %v100_v12 = vpop.eup %99  ;;  %v71_v16 = vmul.f32 2.0, %v66_v13 }
  0x8d   :  { %v74_v14 = vmul.f32 %v100_v12, %v70_v11  ;;  %vm79_vm0 = vweird.f32 %v100_v12 }
  0x8e   :  { %v72_v21 = vadd.f32 1e-10, %v71_v16  ;;  %vm80_vm2 = vmor %vm78_vm1, %vm79_vm0 }
  0x8f   :  { %v75_v15 = vsub.f32 1.0, %v74_v14 }
  0x91   :  { %v76_v18 = vmul.f32 %v100_v12, %v75_v15 }
  0x93   :  { %v77_v20 = vadd.f32 %v100_v12, %v76_v18 }
  0x95   :  { %v81_v23 = vsel %vm80_vm2, %v100_v12, %v77_v20 }
  0x96   :  { %v86_v24 = vsel %vm83_vm3, %v85_v22, %v81_v23 }
  0x97   :  { %v87_v25 = vmul.f32 %v86_v24, %v72_v21 }
  0x99   :  { %v88_v26 = vsub.f32 1.0, %v87_v25 }
  0x9b   :  { %90 = vst.msk [vmem:[%s181_s2] sm:$0xff] %vm89_vm4, %v88_v26 }
  0x9c   :  { %95 = vsyncpa [#allocation5], 1 }
  0x9d   :  { %96 = vsyncpa [#allocation7], 1 }

</bundles_post_ra>
